<compile_context>
chip_gen: v5e
topology: v5e:2x2
jax: 0.10.0
libtpu: 0.0.40
codegen_flags: <defaults>
</compile_context>

<pallas_src>
import functools
import math

import jax
import jax.numpy as jnp
from jax.experimental import pallas as pl
from jax.experimental.pallas import tpu as pltpu


def _policy_kernel(x_ref, w1_ref, b1_ref, wh_ref, bh_ref, eps_ref, out_ref, *,
                   action_dim, action_bound):
    x = x_ref[...]                                                    # (TB, S)

    # fc1 + ReLU  (MXU, f32 accumulate)
    h = jnp.dot(x, w1_ref[...], preferred_element_type=jnp.float32) + b1_ref[...]
    h = jnp.maximum(h, 0.0)                                           # (TB, H)

    # Fused heads: single MXU pass produces [mu | pre_std]            # (TB, 2A)
    head = jnp.dot(h, wh_ref[...], preferred_element_type=jnp.float32) + bh_ref[...]
    mu = head[:, :action_dim]
    pre_std = head[:, action_dim:]

    # softplus(x) = log(1 + exp(x))  (numerically-stable form, EUP exp/log)
    std = jnp.logaddexp(0.0, pre_std)

    # dist = Normal(mu, std); z = dist.rsample() = mu + std * eps
    eps = eps_ref[...]
    z = mu + std * eps

    # Normal log_prob at z: (z - mu)/std == eps exactly -> no divide needed.
    log_prob = (-0.5 * jnp.square(eps)
                - jnp.log(std)
                - 0.5 * math.log(2.0 * math.pi))

    # action = tanh(z); tanh-squash correction exactly as in the PyTorch code
    # (the original applies tanh to the already-tanh'd action; reproduce faithfully).
    action = jnp.tanh(z)
    t2 = jnp.square(jnp.tanh(action))
    log_prob = log_prob - jnp.log(1.0 - t2 + 1e-07)

    # Single store of the packed result: [action * bound | log_prob]  (TB, 2A)
    out_ref[...] = jnp.concatenate(
        [action * action_bound, log_prob], axis=-1).astype(out_ref.dtype)


def policy_net_forward(x, params, eps, action_bound, *, block_b=256):
    """x: (B, state_dim) f32; eps: (B, action_dim) f32; params stored (in, out)."""
    B, S = x.shape
    H = params["w1"].shape[1]
    A = params["wmu"].shape[1]

    # Fuse the two head weights/biases so the kernel does one matmul for mu and std.
    w_head = jnp.concatenate([params["wmu"], params["wstd"]], axis=1)   # (H, 2A)
    b_head = jnp.concatenate([params["bmu"], params["bstd"]], axis=1)   # (1, 2A)

    # Batch tiling: block is a multiple of 8 sublanes; pad B up to the grid extent.
    tb = min(block_b, max(8, ((B + 7) // 8) * 8))
    b_pad = ((B + tb - 1) // tb) * tb
    if b_pad != B:
        x = jnp.pad(x, ((0, b_pad - B), (0, 0)))
        eps = jnp.pad(eps, ((0, b_pad - B), (0, 0)))

    kernel = functools.partial(_policy_kernel, action_dim=A,
                               action_bound=float(action_bound))

    # Advisory cost hint for the XLA scheduler.
    flops = 2 * b_pad * S * H + 2 * b_pad * H * (2 * A) + 12 * b_pad * A
    transcendentals = 5 * b_pad * A          # exp, 2x log, 2x tanh per element
    bytes_accessed = 4 * (b_pad * S + S * H + H + H * 2 * A + 2 * A
                          + b_pad * A + b_pad * 2 * A)

    out = pl.pallas_call(
        kernel,
        out_shape=jax.ShapeDtypeStruct((b_pad, 2 * A), jnp.float32),
        grid=(b_pad // tb,),
        in_specs=[
            pl.BlockSpec((tb, S), lambda i: (i, 0)),        # x       (batch-blocked)
            pl.BlockSpec((S, H), lambda i: (0, 0)),         # w1      (resident)
            pl.BlockSpec((1, H), lambda i: (0, 0)),         # b1      (resident)
            pl.BlockSpec((H, 2 * A), lambda i: (0, 0)),     # w_head  (resident)
            pl.BlockSpec((1, 2 * A), lambda i: (0, 0)),     # b_head  (resident)
            pl.BlockSpec((tb, A), lambda i: (i, 0)),        # eps     (batch-blocked)
        ],
        out_specs=pl.BlockSpec((tb, 2 * A), lambda i: (i, 0)),
        compiler_params=pltpu.CompilerParams(
            dimension_semantics=("parallel",)),              # shards over 2 TCs on v7x
        cost_estimate=pl.CostEstimate(flops=flops,
                                      transcendentals=transcendentals,
                                      bytes_accessed=bytes_accessed),
    )(x, params["w1"], params["b1"], w_head, b_head, eps)

    action = out[:B, :A]
    log_prob = out[:B, A:]
    return action, log_prob


def init_params(key, state_dim, hidden_dim, action_dim):
    """Deterministic synthetic parameters (PyTorch Linear init, stored (in, out))."""
    ks = jax.random.split(key, 6)
    scale1 = 1.0 / math.sqrt(state_dim)
    scale2 = 1.0 / math.sqrt(hidden_dim)
    return {
        "w1":   jax.random.uniform(ks[0], (state_dim, hidden_dim), jnp.float32, -scale1, scale1),
        "b1":   jax.random.uniform(ks[1], (1, hidden_dim),          jnp.float32, -scale1, scale1),
        "wmu":  jax.random.uniform(ks[2], (hidden_dim, action_dim), jnp.float32, -scale2, scale2),
        "bmu":  jax.random.uniform(ks[3], (1, action_dim),          jnp.float32, -scale2, scale2),
        "wstd": jax.random.uniform(ks[4], (hidden_dim, action_dim), jnp.float32, -scale2, scale2),
        "bstd": jax.random.uniform(ks[5], (1, action_dim),          jnp.float32, -scale2, scale2),
    }


def _reference(x, params, eps, action_bound):
    """Pure-JAX mirror of the PyTorch forward (correctness check)."""
    h = jnp.maximum(x @ params["w1"] + params["b1"], 0.0)
    mu = h @ params["wmu"] + params["bmu"]
    std = jnp.logaddexp(0.0, h @ params["wstd"] + params["bstd"])
    z = mu + std * eps
    log_prob = (-0.5 * jnp.square((z - mu) / std) - jnp.log(std)
                - 0.5 * math.log(2.0 * math.pi))
    action = jnp.tanh(z)
    log_prob = log_prob - jnp.log(1.0 - jnp.tanh(action) ** 2 + 1e-07)
    return action * action_bound, log_prob


if __name__ == "__main__":
    batch = 8
    state_dim = 16
    hidden_dim = 32
    action_dim = 8
    action_bound = 2.0

    root = jax.random.PRNGKey(0)
    k_params, k_x, k_eps = jax.random.split(root, 3)

    params = init_params(k_params, state_dim, hidden_dim, action_dim)
    x = jax.random.normal(k_x, (batch, state_dim), dtype=jnp.float32)
    eps = jax.random.normal(k_eps, (batch, action_dim), dtype=jnp.float32)

    action, log_prob = policy_net_forward(x, params, eps, action_bound)
    jax.block_until_ready((action, log_prob))

    assert action.shape == (batch, action_dim)
    assert log_prob.shape == (batch, action_dim)
    assert bool(jnp.all(jnp.isfinite(action))) and bool(jnp.all(jnp.isfinite(log_prob)))

    ref_action, ref_log_prob = _reference(x, params, eps, action_bound)
    assert bool(jnp.allclose(action, ref_action, atol=1e-5, rtol=1e-5))
    assert bool(jnp.allclose(log_prob, ref_log_prob, atol=1e-5, rtol=1e-5))

    print("KERNEL_OK")
</pallas_src>

<mosaic_0001>
module attributes {stable_mosaic.version = 11 : i64} {
  func.func @_policy_kernel(%arg0: i32, %arg1: memref<8x16xf32, #tpu.memory_space<vmem>>, %arg2: memref<16x32xf32, #tpu.memory_space<vmem>>, %arg3: memref<1x32xf32, #tpu.memory_space<vmem>>, %arg4: memref<32x16xf32, #tpu.memory_space<vmem>>, %arg5: memref<1x16xf32, #tpu.memory_space<vmem>>, %arg6: memref<8x8xf32, #tpu.memory_space<vmem>>, %arg7: memref<8x16xf32, #tpu.memory_space<vmem>>) attributes {dimension_semantics = [#tpu.dimension_semantics<parallel>], iteration_bounds = array<i64: 1>, scalar_prefetch = 0 : i64, scratch_operands = 0 : i64, tpu.core_type = #tpu.core_type<tc>, window_params = [{transform_indices = @transform_0, window_bounds = array<i64: 8, 16>}, {pipeline_mode = #tpu.pipeline_mode<synchronous>, transform_indices = @transform_1, window_bounds = array<i64: 16, 32>}, {pipeline_mode = #tpu.pipeline_mode<synchronous>, transform_indices = @transform_2, window_bounds = array<i64: 1, 32>}, {pipeline_mode = #tpu.pipeline_mode<synchronous>, transform_indices = @transform_3, window_bounds = array<i64: 32, 16>}, {pipeline_mode = #tpu.pipeline_mode<synchronous>, transform_indices = @transform_4, window_bounds = array<i64: 1, 16>}, {transform_indices = @transform_5, window_bounds = array<i64: 8, 8>}, {transform_indices = @transform_6, window_bounds = array<i64: 8, 16>}]} {
    %c0 = arith.constant 0 : index
    %c0_0 = arith.constant 0 : index
    %0 = vector.load %arg1[%c0, %c0_0] : memref<8x16xf32, #tpu.memory_space<vmem>>, vector<8x16xf32>
    %c0_1 = arith.constant 0 : index
    %c0_2 = arith.constant 0 : index
    %1 = vector.load %arg2[%c0_1, %c0_2] : memref<16x32xf32, #tpu.memory_space<vmem>>, vector<16x32xf32>
    %cst = arith.constant dense<0.000000e+00> : vector<8x32xf32>
    %2 = tpu.matmul %0, %1, %cst {dimension_numbers = #tpu.dot_dimension_numbers<[1], [0], [0], [1], [0, 0, 1, 1], [], []>} : vector<8x16xf32>, vector<16x32xf32>, vector<8x32xf32> -> vector<8x32xf32>
    %c0_3 = arith.constant 0 : index
    %c0_4 = arith.constant 0 : index
    %3 = vector.load %arg3[%c0_3, %c0_4] : memref<1x32xf32, #tpu.memory_space<vmem>>, vector<1x32xf32>
    %4 = vector.broadcast %3 : vector<1x32xf32> to vector<8x32xf32>
    %5 = arith.addf %2, %4 : vector<8x32xf32>
    %cst_5 = arith.constant 0.000000e+00 : f32
    %6 = vector.broadcast %cst_5 : f32 to vector<8x32xf32>
    %7 = arith.maximumf %5, %6 : vector<8x32xf32>
    %c0_6 = arith.constant 0 : index
    %c0_7 = arith.constant 0 : index
    %8 = vector.load %arg4[%c0_6, %c0_7] : memref<32x16xf32, #tpu.memory_space<vmem>>, vector<32x16xf32>
    %cst_8 = arith.constant dense<0.000000e+00> : vector<8x16xf32>
    %9 = tpu.matmul %7, %8, %cst_8 {dimension_numbers = #tpu.dot_dimension_numbers<[1], [0], [0], [1], [0, 0, 1, 1], [], []>} : vector<8x32xf32>, vector<32x16xf32>, vector<8x16xf32> -> vector<8x16xf32>
    %c0_9 = arith.constant 0 : index
    %c0_10 = arith.constant 0 : index
    %10 = vector.load %arg5[%c0_9, %c0_10] : memref<1x16xf32, #tpu.memory_space<vmem>>, vector<1x16xf32>
    %11 = vector.broadcast %10 : vector<1x16xf32> to vector<8x16xf32>
    %12 = arith.addf %9, %11 : vector<8x16xf32>
    %13 = vector.extract_strided_slice %12 {offsets = [0, 0], sizes = [8, 8], strides = [1, 1]} : vector<8x16xf32> to vector<8x8xf32>
    %14 = vector.extract_strided_slice %12 {offsets = [0, 8], sizes = [8, 8], strides = [1, 1]} : vector<8x16xf32> to vector<8x8xf32>
    %cst_11 = arith.constant 0.000000e+00 : f32
    %15 = vector.broadcast %cst_11 : f32 to vector<8x8xf32>
    %16 = arith.maximumf %15, %14 : vector<8x8xf32>
    %17 = vector.broadcast %cst_11 : f32 to vector<8x8xf32>
    %18 = arith.subf %17, %14 : vector<8x8xf32>
    %19 = arith.cmpf one, %18, %18 : vector<8x8xf32>
    %20 = vector.broadcast %cst_11 : f32 to vector<8x8xf32>
    %21 = arith.addf %20, %14 : vector<8x8xf32>
    %22 = math.absf %18 : vector<8x8xf32>
    %cst_12 = arith.constant 0.000000e+00 : f32
    %23 = vector.broadcast %cst_12 : f32 to vector<8x8xf32>
    %24 = arith.subf %23, %22 : vector<8x8xf32>
    %25 = math.exp %24 : vector<8x8xf32>
    %26 = math.log1p %25 : vector<8x8xf32>
    %27 = arith.addf %16, %26 : vector<8x8xf32>
    %28 = arith.select %19, %21, %27 : vector<8x8xi1>, vector<8x8xf32>
    %c0_13 = arith.constant 0 : index
    %c0_14 = arith.constant 0 : index
    %29 = vector.load %arg6[%c0_13, %c0_14] : memref<8x8xf32, #tpu.memory_space<vmem>>, vector<8x8xf32>
    %30 = arith.mulf %28, %29 : vector<8x8xf32>
    %31 = arith.addf %13, %30 : vector<8x8xf32>
    %32 = arith.mulf %29, %29 : vector<8x8xf32>
    %cst_15 = arith.constant -5.000000e-01 : f32
    %33 = vector.broadcast %cst_15 : f32 to vector<8x8xf32>
    %34 = arith.mulf %33, %32 : vector<8x8xf32>
    %35 = math.log %28 : vector<8x8xf32>
    %36 = arith.subf %34, %35 : vector<8x8xf32>
    %cst_16 = arith.constant 0.918938517 : f32
    %37 = vector.broadcast %cst_16 : f32 to vector<8x8xf32>
    %38 = arith.subf %36, %37 : vector<8x8xf32>
    %39 = math.tanh %31 : vector<8x8xf32>
    %40 = math.tanh %39 : vector<8x8xf32>
    %41 = arith.mulf %40, %40 : vector<8x8xf32>
    %cst_17 = arith.constant 1.000000e+00 : f32
    %42 = vector.broadcast %cst_17 : f32 to vector<8x8xf32>
    %43 = arith.subf %42, %41 : vector<8x8xf32>
    %cst_18 = arith.constant 1.000000e-07 : f32
    %44 = vector.broadcast %cst_18 : f32 to vector<8x8xf32>
    %45 = arith.addf %43, %44 : vector<8x8xf32>
    %46 = math.log %45 : vector<8x8xf32>
    %47 = arith.subf %38, %46 : vector<8x8xf32>
    %cst_19 = arith.constant 2.000000e+00 : f32
    %48 = vector.broadcast %cst_19 : f32 to vector<8x8xf32>
    %49 = arith.mulf %39, %48 : vector<8x8xf32>
    %50 = tpu.concatenate %49, %47 in 1 : vector<8x8xf32>, vector<8x8xf32> -> vector<8x16xf32>
    %c0_20 = arith.constant 0 : index
    %c0_21 = arith.constant 0 : index
    %51 = vector.load %arg7[%c0_20, %c0_21] : memref<8x16xf32, #tpu.memory_space<vmem>>, vector<8x16xf32>
    tpu.vector_store %arg7[%c0_20, %c0_21], %50 {strides = array<i32>} : memref<8x16xf32, #tpu.memory_space<vmem>>, vector<8x16xf32>,
    return
  }
  func.func @transform_0(%arg0: i32) -> (i32, i32) {
    %c0_i32 = arith.constant 0 : i32
    %c0_i32_0 = arith.constant 0 : i32
    return %arg0, %c0_i32 : i32, i32
  }
  func.func @transform_1(%arg0: i32) -> (i32, i32) {
    %c0_i32 = arith.constant 0 : i32
    %c0_i32_0 = arith.constant 0 : i32
    %c0_i32_1 = arith.constant 0 : i32
    return %c0_i32, %c0_i32_0 : i32, i32
  }
  func.func @transform_2(%arg0: i32) -> (i32, i32) {
    %c0_i32 = arith.constant 0 : i32
    %c0_i32_0 = arith.constant 0 : i32
    %c0_i32_1 = arith.constant 0 : i32
    return %c0_i32, %c0_i32_0 : i32, i32
  }
  func.func @transform_3(%arg0: i32) -> (i32, i32) {
    %c0_i32 = arith.constant 0 : i32
    %c0_i32_0 = arith.constant 0 : i32
    %c0_i32_1 = arith.constant 0 : i32
    return %c0_i32, %c0_i32_0 : i32, i32
  }
  func.func @transform_4(%arg0: i32) -> (i32, i32) {
    %c0_i32 = arith.constant 0 : i32
    %c0_i32_0 = arith.constant 0 : i32
    %c0_i32_1 = arith.constant 0 : i32
    return %c0_i32, %c0_i32_0 : i32, i32
  }
  func.func @transform_5(%arg0: i32) -> (i32, i32) {
    %c0_i32 = arith.constant 0 : i32
    %c0_i32_0 = arith.constant 0 : i32
    return %arg0, %c0_i32 : i32, i32
  }
  func.func @transform_6(%arg0: i32) -> (i32, i32) {
    %c0_i32 = arith.constant 0 : i32
    %c0_i32_0 = arith.constant 0 : i32
    return %arg0, %c0_i32 : i32, i32
  }
}

</mosaic_0001>

<bundles_post_ra>
// kernel: tpu_custom_call.1
= control target key start
LH: loop header
LB: loop body
LE: loop exit
PB: predicated region body
PF: predicated region fallthrough
CT: control target
= control target key end

     0   :  { %vm31_vm0 = vcmask 130048   ;;  %s281_s0 = inlined_call_operand.vmem [shape: f32[8,16], index: 0, kind: input, shape index: {}]   ;;  %s282_s1 = inlined_call_operand.vmem [shape: f32[16,32], index: 1, kind: input, shape index: {}]   ;;  %s283_s2 = inlined_call_operand.vmem [shape: f32[1,32], index: 2, kind: input, shape index: {}]   ;;  %s284_s3 = inlined_call_operand.vmem [shape: f32[32,16], index: 3, kind: input, shape index: {}]   ;;  %s285_s4 = inlined_call_operand.vmem [shape: f32[1,16], index: 4, kind: input, shape index: {}]   ;;  %s286_s5 = inlined_call_operand.vmem [shape: f32[8,8], index: 5, kind: input, shape index: {}]   ;;  %s287_s6 = inlined_call_operand.hbm [shape: f32[8,16], index: 6, kind: output, shape index: {}]  }
   0x1   :  { %v26_v0 = vld [vmem:[%s282_s1 + $0x8] sm:$0xff]  ;;  %v25_v1 = vld [vmem:[%s282_s1] sm:$0xff]  ;;  %v59_v3 = vld [vmem:[%s284_s3 + $0x18] sm:$0xff] }
   0x2   :  { %49 = vmatpush.msra.mxu0 %v26_v0  ;;  %v24_v2 = vld [vmem:[%s281_s0] sm:$0xff]  ;;  %80 = vmatpush.msra.mxu1 %v59_v3 }
   0x3   :  { %11 = vsyncpa [#allocation3], 0  ;;  %v58_v4 = vld [vmem:[%s284_s3 + $0x10] sm:$0xff]  ;;  %v57_v5 = vld [vmem:[%s284_s3 + $0x8] sm:$0xff]  ;;  %s206_s11 = smov 8   ;;  %vm64_vm1 = vcmask 261120  }
   0x4   :  { %50 = vmatpush.msra.mxu0 %v25_v1  ;;  %81 = vmatpush.msra.mxu1 %v58_v4  ;;  %v56_v6 = vld [vmem:[%s284_s3] sm:$0xff]  ;;  %s208_s3 = smov [#allocation2]   ;;  %s151_s17 = sshll.u32 %s287_s6, 4  ;;  %vm141_vm4 = vcmask 64512   ;;  %s152_s17 = int_to_ptr.hbm [resolvable:$true] %s151_s17 }
   0x5   :  { %160 = vmatmul.msk.f32.vlgmr.msra.gmra.mxu0 %vm31_vm0, %v24_v2  ;;  %v107_v7 = vld [vmem:[%s286_s5] sm:$0xff] }
   0x6   :  { %82 = vmatpush.msra.mxu1 %v57_v5  ;;  %109 = vrot.lane.b32.xlu0 %v107_v7, %s206_s11  ;;  %v166_v8 = vld [vmem:[%s283_s2] ss:$0 sm:$0xff]  ;;  %s207_s2 = smov 120   ;;  %v118_v40 = vmul.f32 %v107_v7, %v107_v7 }
   0x7   :  { %v167_v12 = vld [vmem:[%s285_s4] ss:$0 sm:$0xff]  ;;  %s149_s4 = sshll.u32 %s208_s3, 4  ;;  %s150_s4 = int_to_ptr.vmem [resolvable:$true] %s149_s4 }
   0x8   :  { %83 = vmatpush.msra.mxu1 %v56_v6  ;;  %v119_v43 = vmul.f32 -0.5, %v118_v40 }
  0x78   :  { %v110_v29 = vpop.permute.xlu0 %109 }
  0x82   :  { %v52_v9 = vpop.f32.mrf.mxu0 }
  0x83   :  { %v53_v10 = vadd.f32 %v166_v8, %v52_v9 }
  0x85   :  { %v55_v11 = vmax.f32 %v53_v10, 0.0 }
  0x87   :  { %161 = vmatmul.msk.f32.vlgmr.msra.gmra.mxu1 %vm64_vm1, %v55_v11 }
 0x104   :  { %v85_v13 = vpop.f32.mrf.mxu1 }
 0x105   :  { %v86_v14 = vadd.f32 %v167_v12, %v85_v13 }
 0x107   :  { %v89_v15 = vsub.f32 0.0, %v86_v14  ;;  %v88_v27 = vmax.f32 %v86_v14, 0.0 }
 0x109   :  { %v92_v16 = vand.u32 2147483647, %v89_v15  ;;  %vm90_vm3 = vcmp.ne.f32.partialorder %v89_v15, %v89_v15 }
 0x10b   :  { %v93_v17 = vsub.f32 0.0, %v92_v16 }
 0x10d   :  { %v94_v18 = vmul.f32 1.442695, %v93_v17 }
 0x10f   :  { %168 = vpow2.f32 %v94_v18 }
 0x115   :  { %v169_v19 = vpop.eup %168 }
 0x116   :  { %v96_v20 = vadd.f32 1.0, %v169_v19  ;;  %v99_v21 = vmul.f32 -0.5, %v169_v19  ;;  %v102_v23 = vand.u32 2147483647, %v169_v19 }
 0x118   :  { %170 = vlog2.f32 %v96_v20  ;;  %v100_v22 = vadd.f32 1.0, %v99_v21  ;;  %vm103_vm2 = vcmp.lt.f32.partialorder %v102_v23, 0.0004427343 }
 0x11a   :  { %v101_v26 = vmul.f32 %v169_v19, %v100_v22 }
 0x11e   :  { %v171_v24 = vpop.eup %170 }
 0x11f   :  { %v98_v25 = vmul.f32 0.6931472, %v171_v24 }
 0x121   :  { %v104_v28 = vsel %vm103_vm2, %v101_v26, %v98_v25 }
 0x122   :  { %v105_v30 = vadd.f32 %v104_v28, %v88_v27 }
 0x124   :  { %v106_v31 = vsel %vm90_vm3, %v86_v14, %v105_v30 }
 0x125   :  { %v112_v32 = vmul.f32 %v110_v29, %v106_v31  ;;  %172 = vlog2.f32 %v106_v31 }
 0x127   :  { %114 = vrot.lane.b32.xlu0 %v112_v32, %s207_s2 }
 0x12b   :  { %v173_v33 = vpop.eup %172 }
 0x12c   :  { %v121_v34 = vmul.f32 0.6931472, %v173_v33 }
 0x12e   :  { %123 = vrot.lane.b32.xlu1 %v121_v34, %s207_s2 }
 0x199   :  { %v115_v35 = vpop.permute.xlu0 %114 }
 0x19a   :  { %v117_v36 = vadd.f32 %v115_v35, %v86_v14 }
 0x19c   :  { %174 = vtanh.f32 %v117_v36 }
 0x1a0   :  { %v124_v44 = vpop.permute.xlu1 %123 }
 0x1a1   :  { %v126_v45 = vsub.f32 %v119_v43, %v124_v44 }
 0x1a2   :  { %v175_v37 = vpop.eup %174 }
 0x1a3   :  { %176 = vtanh.f32 %v175_v37  ;;  %v162_v47 = vadd.f32 -0.9189385, %v126_v45  ;;  %v136_v50 = vmul.f32 2.0, %v175_v37 }
 0x1a9   :  { %v177_v38 = vpop.eup %176 }
 0x1aa   :  { %v130_v39 = vmul.f32 %v177_v38, %v177_v38 }
 0x1ac   :  { %v131_v41 = vsub.f32 1.0, %v130_v39 }
 0x1ae   :  { %v132_v42 = vadd.f32 1e-07, %v131_v41 }
 0x1b0   :  { %178 = vlog2.f32 %v132_v42 }
 0x1b6   :  { %v179_v46 = vpop.eup %178 }
 0x1b7   :  { %v134_v48 = vmul.f32 0.6931472, %v179_v46 }
 0x1b9   :  { %v135_v49 = vsub.f32 %v162_v47, %v134_v48 }
 0x1bb   :  { %138 = vrot.lane.b32.xlu1 %v135_v49, %s206_s11 }
 0x22d   :  { %v139_v51 = vpop.permute.xlu1 %138 }
 0x22e   :  { %v142_v52 = vsel %vm141_vm4, %v136_v50, %v139_v51 }
 0x22f   :  { %143 = vst.msk [vmem:[#allocation2] sm:$0xff] %vm31_vm0, %v142_v52 }
 0x230   :  { %154 = dma.vmem_to_hbm [thread:$0]  %s150_s4, 128, %s152_s17, [#allocation3]  }
 0x231   :  { %204 = dma.done.wait [#allocation3], 128  }
 0x232   :  { %205 = vsyncadd [#allocation3], 4294967168 }
 0x233   :  { %159 = vsyncpa [#allocation3], 1 }

</bundles_post_ra>
